<compile_context>
chip_gen: v7x
topology: tpu7x:2x2x1
jax: 0.10.0
libtpu: 0.0.40
codegen_flags: <defaults>
</compile_context>

<pallas_src>
import jax
import jax.numpy as jnp
from jax.experimental import pallas as pl
from jax.experimental.pallas import tpu as pltpu


def _round_up(x, m):
    return (x + m - 1) // m * m


def _pick_col_tile(c3, cap=1536):
    """Largest multiple of 128 that divides 3C (capped); else full width."""
    if c3 <= cap or c3 % 128 != 0:
        return c3
    best = 128
    for k in range(128, cap + 1, 128):
        if c3 % k == 0:
            best = k
    return best


def _lora_qkv_kernel(x_ref, w_ref, b_ref, a_ref, bl_ref, o_ref, a_acc):
    """One (TM, TN) output block.

    x_ref : (TM, C)      token tile
    w_ref : (C, TN)      W_qkv^T column block
    b_ref : (1, TN)      bias column block (f32)
    a_ref : (C, 2r)      [A_q^T | A_v^T]
    bl_ref: (2r, TN)     B_full column block (B_q^T over q cols, 0 over k,
                         B_v^T over v cols)
    o_ref : (TM, TN)
    a_acc : (TM, 2r) f32 scratch, reused across the column-block axis.
    """
    # LoRA down-projection: compute once per token tile, reuse for every
    # column block (grid axis 1 is innermost / "arbitrary").
    @pl.when(pl.program_id(1) == 0)
    def _():
        a_acc[...] = jnp.dot(x_ref[...], a_ref[...],
                             preferred_element_type=jnp.float32)

    y = jnp.dot(x_ref[...], w_ref[...], preferred_element_type=jnp.float32)
    delta = jnp.dot(a_acc[...].astype(bl_ref.dtype), bl_ref[...],
                    preferred_element_type=jnp.float32)
    o_ref[...] = (y + b_ref[...] + delta).astype(o_ref.dtype)


def prepare_lora_qkv_params(w_qkv, b_qkv, a_q, b_q, a_v, b_v, dtype=None):
    """One-time repack of PyTorch-layout weights (hoist out of the forward).

    w_qkv: (3C, C), b_qkv: (3C,), a_q/a_v: (r, C), b_q/b_v: (C, r).
    dtype: compute dtype for x/weights (e.g. jnp.bfloat16 on v6e/v7x).
    """
    C3, C = w_qkv.shape
    r = a_q.shape[0]
    dtype = dtype or w_qkv.dtype

    w_t = jnp.transpose(w_qkv).astype(dtype)                  # (C, 3C)
    bias = b_qkv.reshape(1, C3).astype(jnp.float32)           # (1, 3C)
    a_all = jnp.concatenate(
        [jnp.transpose(a_q), jnp.transpose(a_v)], axis=1).astype(dtype)  # (C, 2r)

    # Block-sparse up-projection: rows [0:r] feed the q columns with B_q^T,
    # rows [r:2r] feed the v columns with B_v^T, k columns stay zero.
    b_full = jnp.zeros((2 * r, C3), dtype=jnp.float32)
    b_full = b_full.at[:r, :C].set(jnp.transpose(b_q))
    b_full = b_full.at[r:, 2 * C:].set(jnp.transpose(b_v))
    b_full = b_full.astype(dtype)                              # (2r, 3C)
    return w_t, bias, a_all, b_full


def lora_qkv_prepared(x, w_t, bias, a_all, b_full, *,
                      token_tile=None, col_tile=None, out_dtype=None):
    """x: (B, N, C); packed params from prepare_lora_qkv_params."""
    B, N, C = x.shape
    M = B * N
    C3 = w_t.shape[1]
    r2 = a_all.shape[1]
    out_dtype = out_dtype or x.dtype
    cdt = w_t.dtype  # compute dtype

    # Token (row) tiling: 256 for real workloads, rounded-up M for tiny ones.
    if token_tile is None:
        token_tile = 256 if M >= 256 else _round_up(M, 8)
    tm = token_tile
    Mp = _round_up(M, tm)

    # Output-channel (lane) tiling: multiple of 128 when possible.
    if col_tile is None:
        col_tile = _pick_col_tile(C3)
    tn = col_tile
    assert C3 % tn == 0 and (tn % 128 == 0 or tn == C3)

    xf = x.reshape(M, C).astype(cdt)
    if Mp != M:
        xf = jnp.pad(xf, ((0, Mp - M), (0, 0)))   # padded rows sliced off below

    grid = (Mp // tm, C3 // tn)

    # Explicit scoped-VMEM budget: double-buffered operands + output + scratch.
    isz = jnp.dtype(cdt).itemsize
    osz = jnp.dtype(out_dtype).itemsize
    vmem = (2 * (tm * C + C * tn + r2 * tn + C * r2) * isz
            + 2 * tn * 4                      # bias (f32)
            + 2 * tm * tn * osz               # output tile
            + tm * r2 * 4)                    # scratch
    vmem_limit = int(min(64 * 2**20, max(vmem + 4 * 2**20, 16 * 2**20)))

    out = pl.pallas_call(
        _lora_qkv_kernel,
        out_shape=jax.ShapeDtypeStruct((Mp, C3), out_dtype),
        grid_spec=pltpu.PrefetchScalarGridSpec(
            num_scalar_prefetch=0,
            grid=grid,
            in_specs=[
                pl.BlockSpec((tm, C), lambda i, j: (i, 0)),    # x token tile
                pl.BlockSpec((C, tn), lambda i, j: (0, j)),    # W_qkv^T block
                pl.BlockSpec((1, tn), lambda i, j: (0, j)),    # bias block
                pl.BlockSpec((C, r2), lambda i, j: (0, 0)),    # A_all
                pl.BlockSpec((r2, tn), lambda i, j: (0, j)),   # B_full block
            ],
            out_specs=pl.BlockSpec((tm, tn), lambda i, j: (i, j)),
            scratch_shapes=[pltpu.VMEM((tm, r2), jnp.float32)],
        ),
        compiler_params=pltpu.CompilerParams(
            dimension_semantics=("parallel", "arbitrary"),
            vmem_limit_bytes=vmem_limit),
    )(xf, w_t, bias, a_all, b_full)

    if Mp != M:
        out = out[:M]
    return out.reshape(B, N, C3)


def lora_qkv(x, w_qkv, b_qkv, a_q, b_q, a_v, b_v, *,
             dtype=None, token_tile=None, col_tile=None):
    """Convenience wrapper taking raw PyTorch-layout parameters.

    In a real model call prepare_lora_qkv_params() ONCE at load time and reuse
    the packed params every forward — the weight transposes are hoisted there
    for exactly that reason.
    """
    packed = prepare_lora_qkv_params(w_qkv, b_qkv, a_q, b_q, a_v, b_v,
                                     dtype=dtype)
    return lora_qkv_prepared(x, *packed, token_tile=token_tile,
                             col_tile=col_tile)


def _reference(x, w_qkv, b_qkv, a_q, b_q, a_v, b_v):
    qkv = jnp.einsum("bnc,oc->bno", x, w_qkv) + b_qkv
    new_q = jnp.einsum("bnr,or->bno", jnp.einsum("bnc,rc->bnr", x, a_q), b_q)
    new_v = jnp.einsum("bnr,or->bno", jnp.einsum("bnc,rc->bnr", x, a_v), b_v)
    dim = x.shape[-1]
    qkv = qkv.at[..., :dim].add(new_q)
    qkv = qkv.at[..., -dim:].add(new_v)
    return qkv


if __name__ == "__main__":
    # Small deterministic setup: B=2, N=8 tokens, C(dim)=32, LoRA rank r=4.
    B, N, C, r = 2, 8, 32, 4
    key = jax.random.PRNGKey(0)
    ks = jax.random.split(key, 7)

    x = jax.random.normal(ks[0], (B, N, C), dtype=jnp.float32)

    # PyTorch Linear layouts: (out, in).
    w_qkv = jax.random.normal(ks[1], (3 * C, C), dtype=jnp.float32) * 0.05
    b_qkv = jax.random.normal(ks[2], (3 * C,), dtype=jnp.float32) * 0.01
    a_q = jax.random.normal(ks[3], (r, C), dtype=jnp.float32) * 0.05
    b_q = jax.random.normal(ks[4], (C, r), dtype=jnp.float32) * 0.05
    a_v = jax.random.normal(ks[5], (r, C), dtype=jnp.float32) * 0.05
    b_v = jax.random.normal(ks[6], (C, r), dtype=jnp.float32) * 0.05

    out = lora_qkv(x, w_qkv, b_qkv, a_q, b_q, a_v, b_v)
    out = jax.block_until_ready(out)

    ref = _reference(x, w_qkv, b_qkv, a_q, b_q, a_v, b_v)
    assert out.shape == (B, N, 3 * C)
    assert jnp.allclose(out, ref, atol=1e-4, rtol=1e-4), "mismatch vs reference"

    print("KERNEL_OK")
</pallas_src>

<mosaic_0001>
module attributes {stable_mosaic.version = 11 : i64} {
  func.func @_lora_qkv_kernel(%arg0: i32, %arg1: i32, %arg2: memref<16x32xf32, #tpu.memory_space<vmem>>, %arg3: memref<32x96xf32, #tpu.memory_space<vmem>>, %arg4: memref<1x96xf32, #tpu.memory_space<vmem>>, %arg5: memref<32x8xf32, #tpu.memory_space<vmem>>, %arg6: memref<8x96xf32, #tpu.memory_space<vmem>>, %arg7: memref<16x96xf32, #tpu.memory_space<vmem>>, %arg8: memref<16x8xf32, #tpu.memory_space<vmem>>) attributes {dimension_semantics = [#tpu.dimension_semantics<parallel>, #tpu.dimension_semantics<arbitrary>], iteration_bounds = array<i64: 1, 1>, scalar_prefetch = 0 : i64, scratch_operands = 1 : i64, tpu.core_type = #tpu.core_type<tc>, window_params = [{transform_indices = @transform_0, window_bounds = array<i64: 16, 32>}, {transform_indices = @transform_1, window_bounds = array<i64: 32, 96>}, {transform_indices = @transform_2, window_bounds = array<i64: 1, 96>}, {pipeline_mode = #tpu.pipeline_mode<synchronous>, transform_indices = @transform_3, window_bounds = array<i64: 32, 8>}, {transform_indices = @transform_4, window_bounds = array<i64: 8, 96>}, {transform_indices = @transform_5, window_bounds = array<i64: 16, 96>}]} {
    %c0_i32 = arith.constant 0 : i32
    %0 = arith.cmpi eq, %arg1, %c0_i32 : i32
    %1 = arith.extui %0 : i1 to i32
    %c0_i32_0 = arith.constant 0 : i32
    %2 = arith.cmpi ne, %1, %c0_i32_0 : i32
    scf.if %2 {
      %c0_13 = arith.constant 0 : index
      %c0_14 = arith.constant 0 : index
      %14 = vector.load %arg2[%c0_13, %c0_14] : memref<16x32xf32, #tpu.memory_space<vmem>>, vector<16x32xf32>
      %c0_15 = arith.constant 0 : index
      %c0_16 = arith.constant 0 : index
      %15 = vector.load %arg5[%c0_15, %c0_16] : memref<32x8xf32, #tpu.memory_space<vmem>>, vector<32x8xf32>
      %cst_17 = arith.constant dense<0.000000e+00> : vector<16x8xf32>
      %16 = tpu.matmul %14, %15, %cst_17 {dimension_numbers = #tpu.dot_dimension_numbers<[1], [0], [0], [1], [0, 0, 1, 1], [], []>} : vector<16x32xf32>, vector<32x8xf32>, vector<16x8xf32> -> vector<16x8xf32>
      %c0_18 = arith.constant 0 : index
      %c0_19 = arith.constant 0 : index
      %17 = vector.load %arg8[%c0_18, %c0_19] : memref<16x8xf32, #tpu.memory_space<vmem>>, vector<16x8xf32>
      tpu.vector_store %arg8[%c0_18, %c0_19], %16 {strides = array<i32>} : memref<16x8xf32, #tpu.memory_space<vmem>>, vector<16x8xf32>,
    } else {
    }
    %c0 = arith.constant 0 : index
    %c0_1 = arith.constant 0 : index
    %3 = vector.load %arg2[%c0, %c0_1] : memref<16x32xf32, #tpu.memory_space<vmem>>, vector<16x32xf32>
    %c0_2 = arith.constant 0 : index
    %c0_3 = arith.constant 0 : index
    %4 = vector.load %arg3[%c0_2, %c0_3] : memref<32x96xf32, #tpu.memory_space<vmem>>, vector<32x96xf32>
    %cst = arith.constant dense<0.000000e+00> : vector<16x96xf32>
    %5 = tpu.matmul %3, %4, %cst {dimension_numbers = #tpu.dot_dimension_numbers<[1], [0], [0], [1], [0, 0, 1, 1], [], []>} : vector<16x32xf32>, vector<32x96xf32>, vector<16x96xf32> -> vector<16x96xf32>
    %c0_4 = arith.constant 0 : index
    %c0_5 = arith.constant 0 : index
    %6 = vector.load %arg8[%c0_4, %c0_5] : memref<16x8xf32, #tpu.memory_space<vmem>>, vector<16x8xf32>
    %c0_6 = arith.constant 0 : index
    %c0_7 = arith.constant 0 : index
    %7 = vector.load %arg6[%c0_6, %c0_7] : memref<8x96xf32, #tpu.memory_space<vmem>>, vector<8x96xf32>
    %cst_8 = arith.constant dense<0.000000e+00> : vector<16x96xf32>
    %8 = tpu.matmul %6, %7, %cst_8 {dimension_numbers = #tpu.dot_dimension_numbers<[1], [0], [0], [1], [0, 0, 1, 1], [], []>} : vector<16x8xf32>, vector<8x96xf32>, vector<16x96xf32> -> vector<16x96xf32>
    %c0_9 = arith.constant 0 : index
    %c0_10 = arith.constant 0 : index
    %9 = vector.load %arg4[%c0_9, %c0_10] : memref<1x96xf32, #tpu.memory_space<vmem>>, vector<1x96xf32>
    %10 = vector.broadcast %9 : vector<1x96xf32> to vector<16x96xf32>
    %11 = arith.addf %5, %10 : vector<16x96xf32>
    %12 = arith.addf %11, %8 : vector<16x96xf32>
    %c0_11 = arith.constant 0 : index
    %c0_12 = arith.constant 0 : index
    %13 = vector.load %arg7[%c0_11, %c0_12] : memref<16x96xf32, #tpu.memory_space<vmem>>, vector<16x96xf32>
    tpu.vector_store %arg7[%c0_11, %c0_12], %12 {strides = array<i32>} : memref<16x96xf32, #tpu.memory_space<vmem>>, vector<16x96xf32>,
    return
  }
  func.func @transform_0(%arg0: i32, %arg1: i32) -> (i32, i32) {
    %c0_i32 = arith.constant 0 : i32
    %c0_i32_0 = arith.constant 0 : i32
    return %arg0, %c0_i32 : i32, i32
  }
  func.func @transform_1(%arg0: i32, %arg1: i32) -> (i32, i32) {
    %c0_i32 = arith.constant 0 : i32
    %c0_i32_0 = arith.constant 0 : i32
    return %c0_i32, %arg1 : i32, i32
  }
  func.func @transform_2(%arg0: i32, %arg1: i32) -> (i32, i32) {
    %c0_i32 = arith.constant 0 : i32
    %c0_i32_0 = arith.constant 0 : i32
    return %c0_i32, %arg1 : i32, i32
  }
  func.func @transform_3(%arg0: i32, %arg1: i32) -> (i32, i32) {
    %c0_i32 = arith.constant 0 : i32
    %c0_i32_0 = arith.constant 0 : i32
    %c0_i32_1 = arith.constant 0 : i32
    return %c0_i32, %c0_i32_0 : i32, i32
  }
  func.func @transform_4(%arg0: i32, %arg1: i32) -> (i32, i32) {
    %c0_i32 = arith.constant 0 : i32
    %c0_i32_0 = arith.constant 0 : i32
    return %c0_i32, %arg1 : i32, i32
  }
  func.func @transform_5(%arg0: i32, %arg1: i32) -> (i32, i32) {
    %c0_i32 = arith.constant 0 : i32
    return %arg0, %arg1 : i32, i32
  }
}

</mosaic_0001>

<bundles_post_ra>
// kernel: tpu_custom_call.1
= control target key start
LH: loop header
LB: loop body
LE: loop exit
PB: predicated region body
PF: predicated region fallthrough
CT: control target
= control target key end

     0   :  { %10 = vsyncpa [#allocation4], 0  ;;  %s551_s0 = inlined_call_operand.hbm [shape: f32[16,32], index: 0, kind: input, shape index: {}]   ;;  %s552_s1 = inlined_call_operand.vmem [shape: f32[32,96], index: 1, kind: input, shape index: {}]   ;;  %s553_s2 = inlined_call_operand.vmem [shape: f32[1,96], index: 2, kind: input, shape index: {}]   ;;  %s554_s3 = inlined_call_operand.vmem [shape: f32[32,8], index: 3, kind: input, shape index: {}]   ;;  %s555_s4 = inlined_call_operand.vmem [shape: f32[8,96], index: 4, kind: input, shape index: {}]   ;;  %s556_s5 = inlined_call_operand.hbm [shape: f32[16,96], index: 5, kind: output, shape index: {}]  }
   0x1   :  { %11 = vsyncpa [#allocation5], 0  ;;  %s453_s18 = smov [#allocation3]   ;;  %s405_s22 = scalar_lea.hbm %s551_s0, 256 }
   0x2   :  { %s17_s19 = sshll.u32 %s453_s18, 4  ;;  %p406_p0 = scmp.ne.s32.totalorder %s551_s0, %s405_s22  ;;  %s18_s19 = int_to_ptr.vmem [resolvable:$true] %s17_s19 }
   0x3   :  { %p409_p1 = scmp.lt.u32.totalorder %s405_s22, %s551_s0 }
   0x5   :  { %p411_p2 = pnand %p409_p1, %p406_p0 }
   0x7   :  { %414 = shalt.err (!%p411_p2)
}
   0x8   :  { %s415_s27 = scalar_lea.vmem %s18_s19, 256  ;;  %p420_p4 = scmp.lt.s32.totalorder %s18_s19, %s18_s19 }
   0x9   :  { %p416_p3 = scmp.ne.s32.totalorder %s18_s19, %s415_s27  ;;  %p421_p5 = scmp.lt.s32.totalorder %s415_s27, %s415_s27 }
   0xb   :  { %p422_p6 = por %p421_p5, %p420_p4 }
   0xd   :  { %p423_p7 = pnand %p422_p6, %p416_p3 }
   0xf   :  { %426 = shalt.err (!%p423_p7)
}
  0x10   :  { %s454_s28 = smov 128   ;;  %s455_s29 = smov 8  }
  0x11   :  { %23 = dma.hbm_to_vmem [thread:$0]  %s551_s0, 256, %s18_s19, [#allocation4], %s454_s28, %s454_s28, %s455_s29  }
  0x12   :  { %449 = dma.done.wait [#allocation4], 256  }
  0x13   :  { %450 = vsyncadd [#allocation4], 4294967040  ;;  %vm45_vm0 = vcmask 261120   ;;  %v41_v0 = vld [vmem:[%s554_s3] sm:$0xff]  ;;  %v42_v1 = vld [vmem:[%s554_s3 + $0x8] sm:$0xff]  ;;  %vm127_vm1 = vcmask 64512  }
  0x14   :  { %v43_v2 = vld [vmem:[%s554_s3 + $0x10] sm:$0xff]  ;;  %v381_v3 = vpack.c.bf16 %v42_v1, %v41_v0  ;;  %v44_v4 = vld [vmem:[%s554_s3 + $0x18] sm:$0xff]  ;;  %v138_v8 = vld [vmem:[%s555_s4] sm:$0xff]  ;;  %s456_s24 = smov [#allocation6]   ;;  %vm312_vm2 = vcmask 785408  }
  0x15   :  { %v39_v5 = vld [vmem:[#allocation3] sm:$0xff]  ;;  %v385_v6 = vpack.c.bf16 %v44_v4, %v43_v2  ;;  %v40_v7 = vld [vmem:[#allocation3 + $0x8] sm:$0xff]  ;;  %365 = vmatprep.subr.mxu1 %v138_v8  ;;  %v132_v9 = vld [vmem:[%s552_s1] sm:$0xff]  ;;  %s320_s25 = sshll.u32 %s456_s24, 4  ;;  %s321_s25 = int_to_ptr.vmem [resolvable:$true] %s320_s25 }
  0x16   :  { %362 = vmatprep.mubr.msk.f32.mxu0 %vm45_vm0, %v39_v5  ;;  %382 = vmatprep.subr.bf16.mxu0 %v381_v3  ;;  %v133_v10 = vld [vmem:[%s552_s1 + $0x8] sm:$0xff]  ;;  %v134_v14 = vld [vmem:[%s552_s1 + $0x10] sm:$0xff]  ;;  %v135_v15 = vld [vmem:[%s552_s1 + $0x18] sm:$0xff]  ;;  %s427_s1 = scalar_lea.vmem %s321_s25, 256  ;;  %p432_p9 = scmp.lt.s32.totalorder %s321_s25, %s321_s25 }
  0x17   :  { %384 = vmatpush3.bf16.msra.mxu0 %v381_v3  ;;  %366 = vmatpush3.msra.mxu1 %v138_v8  ;;  %v389_v11 = vpack.c.bf16 %v133_v10, %v132_v9  ;;  %v393_v17 = vpack.c.bf16 %v135_v15, %v134_v14  ;;  %v336_v19 = vld [vmem:[%s553_s2] ss:$0 sm:$0xff]  ;;  %p428_p8 = scmp.ne.s32.totalorder %s321_s25, %s427_s1  ;;  %p433_p10 = scmp.lt.s32.totalorder %s427_s1, %s427_s1 }
  0x18   :  { %386 = vmatprep.subr.bf16.mxu0 %v385_v6 }
  0x19   :  { %390 = vmatprep.subr.bf16.mxu1 %v389_v11  ;;  %p434_p11 = por %p433_p10, %p432_p9 }
  0x1b   :  { %388 = vmatpush3.bf16.msra.mxu0 %v385_v6  ;;  %p435_p12 = pnand %p434_p11, %p428_p8 }
  0x1e   :  { %363 = vmatmul.mubr.msk.f32.vlgmr.msra.gmra.mrb[0].mxu0 %vm45_vm0, %v40_v7 }
  0xf1   :  { %v364_v12 = vpop.f32.mrb[0].mxu0 }
  0xf2   :  { %129 = vst.msk [vmem:[#allocation2 + $0x8] sm:$0xff] %vm127_vm1, %v364_v12  ;;  %v118_v13 = vpop.f32.mrb[1].mxu0 }
  0xf3   :  { %128 = vst.msk [vmem:[#allocation2] sm:$0xff] %vm127_vm1, %v118_v13 }
  0xf9   :  { %v137_v18 = vld [vmem:[#allocation2 + $0x8] sm:$0xff] }
  0xfa   :  { %v136_v16 = vld [vmem:[#allocation2] sm:$0xff] }
  0xfb   :  { %367 = vmatprep.mubr.msk.f32.mxu1 %vm127_vm1, %v136_v16 }
  0xfc   :  { %368 = vmatmul.mubr.msk.f32.vlgmr.msra.gmra.mrb[0].mxu1 %vm127_vm1, %v137_v18 }
  0xfd   :  { %392 = vmatpush3.bf16.msra.mxu1 %v389_v11  ;;  %378 = vmatprep.mubr.msk.f32.mxu1 %vm45_vm0, %v39_v5 }
  0xfe   :  { %394 = vmatprep.subr.bf16.mxu1 %v393_v17 }
 0x101   :  { %396 = vmatpush3.bf16.msra.mxu1 %v393_v17 }
 0x104   :  { %379 = vmatmul.mubr.msk.f32.vlgmr.msra.gmra.mrb[0].mxu1 %vm45_vm0, %v40_v7 }
 0x1d7   :  { %v380_v20 = vpop.f32.mrb[0].mxu1 }
 0x1d8   :  { %v307_v21 = vadd.f32 %v380_v20, %v336_v19  ;;  %v301_v22 = vpop.f32.mrb[1].mxu1 }
 0x1d9   :  { %v302_v23 = vadd.f32 %v336_v19, %v301_v22 }
 0x1da   :  { %314 = vst.msk [vmem:[#allocation6 + $0x8] sm:$0xff] %vm312_vm2, %v307_v21 }
 0x1db   :  { %313 = vst.msk [vmem:[#allocation6] sm:$0xff] %vm312_vm2, %v302_v23 }
 0x1dc   :  { %438 = shalt.err (!%p435_p12)
}
 0x1dd   :  { %s439_s2 = scalar_lea.hbm %s556_s5, 256 }
 0x1de   :  { %p440_p13 = scmp.ne.s32.totalorder %s556_s5, %s439_s2  ;;  %p443_p0 = scmp.lt.u32.totalorder %s439_s2, %s556_s5 }
 0x1e0   :  { %p445_p1 = pnand %p443_p0, %p440_p13 }
 0x1e2   :  { %448 = shalt.err (!%p445_p1)
}
 0x1e3   :  { %326 = dma.vmem_to_hbm [thread:$0]  %s321_s25, 256, %s556_s5, [#allocation5], %s454_s28, %s454_s28, %s455_s29  }
 0x1e4   :  { %451 = dma.done.wait [#allocation5], 256  }
 0x1e5   :  { %452 = vsyncadd [#allocation5], 4294967040 }
 0x1e6   :  { %330 = vsyncpa [#allocation4], 1 }
 0x1e7   :  { %331 = vsyncpa [#allocation5], 1 }

</bundles_post_ra>
